<compile_context>
chip_gen: v5e
topology: v5e:2x2
jax: 0.10.0
libtpu: 0.0.40
codegen_flags: <defaults>
</compile_context>

<pallas_src>
import functools
import math

import jax
import jax.numpy as jnp
from jax import lax
from jax.experimental import pallas as pl
from jax.experimental.pallas import tpu as pltpu


def _pick_tile(dim, candidates):
    for c in candidates:
        if c <= dim and dim % c == 0:
            return c
    return dim


# --------------------------- tiled projection matmul ---------------------------
def _matmul_kernel(x_ref, w_ref, o_ref, acc_ref):
    @pl.when(pl.program_id(2) == 0)
    def _():
        acc_ref[...] = jnp.zeros(acc_ref.shape, acc_ref.dtype)

    acc_ref[...] += jnp.dot(x_ref[...], w_ref[...],
                            preferred_element_type=jnp.float32)

    @pl.when(pl.program_id(2) == pl.num_programs(2) - 1)
    def _():
        o_ref[...] = acc_ref[...].astype(o_ref.dtype)


def pallas_matmul(x, w):
    """x: (M, K), w: (K, N) -> (M, N), tiled with an f32 VMEM accumulator."""
    M, K = x.shape
    K2, N = w.shape
    assert K == K2
    tm = _pick_tile(M, (256, 128, 64, 32, 16, 8))
    tn = _pick_tile(N, (512, 256, 128))
    tk = _pick_tile(K, (512, 256, 128))
    grid = (M // tm, N // tn, K // tk)
    return pl.pallas_call(
        _matmul_kernel,
        out_shape=jax.ShapeDtypeStruct((M, N), x.dtype),
        grid=grid,
        in_specs=[
            pl.BlockSpec((tm, tk), lambda i, j, k: (i, k)),
            pl.BlockSpec((tk, tn), lambda i, j, k: (k, j)),
        ],
        out_specs=pl.BlockSpec((tm, tn), lambda i, j, k: (i, j)),
        scratch_shapes=[pltpu.VMEM((tm, tn), jnp.float32)],
        compiler_params=pltpu.CompilerParams(
            dimension_semantics=("parallel", "parallel", "arbitrary")),
    )(x, w)


# ------------------------ flash GQA attention (+ RoPE) -------------------------
def _flash_gqa_kernel(q_ref, k_ref, v_ref, cq_ref, sq_ref, ck_ref, sk_ref,
                      rot_ref, o_ref, m_sc, l_sc, acc_sc, *,
                      scale, repeats, tq, tk):
    qi = pl.program_id(2)
    ki = pl.program_id(3)
    D = q_ref.shape[-1]
    RQ = repeats * tq

    @pl.when(ki == 0)
    def _init():
        m_sc[...] = jnp.full(m_sc.shape, -jnp.inf, m_sc.dtype)
        l_sc[...] = jnp.zeros(l_sc.shape, l_sc.dtype)
        acc_sc[...] = jnp.zeros(acc_sc.shape, acc_sc.dtype)

    # Skip KV tiles that lie entirely above the causal diagonal of this Q tile.
    @pl.when(ki * tk <= qi * tq + (tq - 1))
    def _compute():
        rot = rot_ref[...]                                    # (D, D) f32

        # RoPE on Q (half-split layout); attention scale folded in here.
        q3 = q_ref[0].astype(jnp.float32)                     # (repeats, tq, D)
        q2 = q3.reshape(RQ, D)
        q_rot3 = jnp.dot(q2, rot,
                         preferred_element_type=jnp.float32).reshape(
                             repeats, tq, D)
        cq = cq_ref[...][None]
        sq = sq_ref[...][None]
        q_rope = ((q3 * cq + q_rot3 * sq) * scale).astype(
            q_ref.dtype).reshape(RQ, D)

        # RoPE on K.
        k2 = k_ref[0, 0].astype(jnp.float32)                  # (tk, D)
        k_rot = jnp.dot(k2, rot, preferred_element_type=jnp.float32)
        k_rope = (k2 * ck_ref[...] + k_rot * sk_ref[...]).astype(k_ref.dtype)

        # Scores: contract head_dim directly (q . k^T), f32 accumulation.
        s = lax.dot_general(q_rope, k_rope, (((1,), (1,)), ((), ())),
                            preferred_element_type=jnp.float32)  # (RQ, tk)

        # Causal mask on global positions (rows are head-major: r*tq + t).
        row = lax.broadcasted_iota(jnp.int32, (RQ, tk), 0)
        col = lax.broadcasted_iota(jnp.int32, (RQ, tk), 1)
        q_pos = qi * tq + row % tq
        k_pos = ki * tk + col
        s = jnp.where(k_pos <= q_pos, s, -jnp.inf)

        # Online softmax update (statistics stay in f32).
        m_prev = m_sc[...]
        m_new = jnp.maximum(m_prev, jnp.max(s, axis=-1, keepdims=True))
        alpha = jnp.exp(m_prev - m_new)
        p = jnp.exp(s - m_new)
        l_sc[...] = alpha * l_sc[...] + jnp.sum(p, axis=-1, keepdims=True)
        acc_sc[...] = alpha * acc_sc[...] + jnp.dot(
            p.astype(v_ref.dtype), v_ref[0, 0],
            preferred_element_type=jnp.float32)
        m_sc[...] = m_new

    @pl.when(ki == pl.num_programs(3) - 1)
    def _finalize():
        inv_l = pl.reciprocal(l_sc[...], approx=True)         # EUP reciprocal
        out3 = (acc_sc[...] * inv_l).reshape(repeats, tq, D)
        # Write the whole query-head group as a (tq, repeats*D) slab so the
        # output block is lane-dense along its last dim.
        for r in range(repeats):
            o_ref[0, 0, :, r * D:(r + 1) * D] = out3[r].astype(o_ref.dtype)


def pallas_gqa_flash_attention(q, k, v, cos_hs, sin_hs, rot, *, scale):
    """q: (B, Hq, T, D); k, v: (B, Hkv, T, D) -> (B, Hkv, T, repeats*D).

    Output element [b, g, t, r*D + d] is the attention output of query head
    h = g*repeats + r at position t (grouped by the KV head it shares).
    """
    B, Hq, T, D = q.shape
    _, Hkv, _, _ = k.shape
    repeats = Hq // Hkv
    tq = _pick_tile(T, (128, 64, 32, 16, 8))
    tk = _pick_tile(T, (256, 128, 64, 32, 16, 8))
    nq, nk = T // tq, T // tk
    RQ = repeats * tq

    kernel = functools.partial(_flash_gqa_kernel, scale=scale,
                               repeats=repeats, tq=tq, tk=tk)
    return pl.pallas_call(
        kernel,
        out_shape=jax.ShapeDtypeStruct((B, Hkv, T, repeats * D), q.dtype),
        grid=(B, Hkv, nq, nk),
        in_specs=[
            pl.BlockSpec((1, repeats, tq, D), lambda b, g, i, j: (b, g, i, 0)),
            pl.BlockSpec((1, 1, tk, D), lambda b, g, i, j: (b, g, j, 0)),
            pl.BlockSpec((1, 1, tk, D), lambda b, g, i, j: (b, g, j, 0)),
            pl.BlockSpec((tq, D), lambda b, g, i, j: (i, 0)),  # cos for Q rows
            pl.BlockSpec((tq, D), lambda b, g, i, j: (i, 0)),  # sin for Q rows
            pl.BlockSpec((tk, D), lambda b, g, i, j: (j, 0)),  # cos for K rows
            pl.BlockSpec((tk, D), lambda b, g, i, j: (j, 0)),  # sin for K rows
            pl.BlockSpec((D, D), lambda b, g, i, j: (0, 0)),   # rotate_half matrix
        ],
        out_specs=pl.BlockSpec((1, 1, tq, repeats * D),
                               lambda b, g, i, j: (b, g, i, 0)),
        scratch_shapes=[
            pltpu.VMEM((RQ, 1), jnp.float32),    # running max
            pltpu.VMEM((RQ, 1), jnp.float32),    # running denom
            pltpu.VMEM((RQ, D), jnp.float32),    # running output accumulator
        ],
        compiler_params=pltpu.CompilerParams(
            dimension_semantics=("parallel", "parallel", "parallel",
                                 "arbitrary")),
    )(q, k, v, cos_hs, sin_hs, cos_hs, sin_hs, rot)


# --------------------------------- full forward --------------------------------
def _half_split_perm(head_dim):
    # interleaved (r0, i0, r1, i1, ...) -> half-split (r0, r1, ..., i0, i1, ...)
    return jnp.concatenate([jnp.arange(0, head_dim, 2),
                            jnp.arange(1, head_dim, 2)])


def _rotate_half_matrix(head_dim, dtype=jnp.float32):
    h = head_dim // 2
    eye = jnp.eye(h, dtype=dtype)
    z = jnp.zeros((h, h), dtype=dtype)
    return jnp.block([[z, eye], [-eye, z]])   # x @ R == concat(-x2, x1)


def gqa_forward(params, x, cos, sin, *, n_head, n_kv_head, head_dim):
    """Eval-mode forward of GroupedQueryAttention.

    params: wq (E, Hq*D), wk/wv (E, Hkv*D), wo (Hq*D, E) stored as (in, out),
            i.e. y = x @ W  ==  PyTorch nn.Linear (weight W^T, bias=False).
    cos/sin: (T, D//2)  (cos/sin of the freqs_cis angles).
    """
    B, T, E = x.shape
    D = head_dim
    Hq, Hkv = n_head, n_kv_head
    scale = D ** (-0.5)

    # One-time weight prep (amortized at load time in real use): permute wq/wk
    # columns per head to the half-split RoPE layout and fuse q/k/v projections
    # so x is streamed from HBM once.
    perm = _half_split_perm(D)
    wq_hs = params["wq"].reshape(E, Hq, D)[:, :, perm].reshape(E, Hq * D)
    wk_hs = params["wk"].reshape(E, Hkv, D)[:, :, perm].reshape(E, Hkv * D)
    wqkv = jnp.concatenate([wq_hs, wk_hs, params["wv"]], axis=1)

    cos_hs = jnp.concatenate([cos, cos], axis=-1)   # (T, D)
    sin_hs = jnp.concatenate([sin, sin], axis=-1)   # (T, D)
    rot = _rotate_half_matrix(D)

    # Fused QKV projection.
    qkv = pallas_matmul(x.reshape(B * T, E), wqkv)
    q = qkv[:, :Hq * D].reshape(B, T, Hq, D)
    k = qkv[:, Hq * D:(Hq + Hkv) * D].reshape(B, T, Hkv, D)
    v = qkv[:, (Hq + Hkv) * D:].reshape(B, T, Hkv, D)

    # (B, H, T, D) layout for the attention kernel.
    # TODO(synk): fold these transposes into the projection kernel's out_specs.
    q = jnp.transpose(q, (0, 2, 1, 3))
    k = jnp.transpose(k, (0, 2, 1, 3))
    v = jnp.transpose(v, (0, 2, 1, 3))

    # Flash GQA attention with fused RoPE.
    y = pallas_gqa_flash_attention(q, k, v, cos_hs, sin_hs, rot, scale=scale)
    # TODO(synk): attention/residual dropout omitted — eval-mode (training=False) identity.

    # (B, Hkv, T, repeats*D) -> (B*T, Hq*D) with columns in head-major order.
    y = jnp.transpose(y, (0, 2, 1, 3)).reshape(B * T, Hq * D)

    # Output projection.
    return pallas_matmul(y, params["wo"]).reshape(B, T, E)


# --------------------------- pure-jnp reference (spec) --------------------------
def reference_forward(params, x, cos, sin, *, n_head, n_kv_head, head_dim):
    B, T, E = x.shape
    repeats = n_head // n_kv_head
    scale = head_dim ** (-0.5)

    q = (x.reshape(B * T, E) @ params["wq"]).reshape(B, T, n_head, head_dim)
    k = (x.reshape(B * T, E) @ params["wk"]).reshape(B, T, n_kv_head, head_dim)
    v = (x.reshape(B * T, E) @ params["wv"]).reshape(B, T, n_kv_head, head_dim)

    def rope(t):  # interleaved (even, odd) pairs, like torch.view_as_complex path
        tr, ti = t[..., 0::2], t[..., 1::2]
        c = cos[None, :, None, :]
        s = sin[None, :, None, :]
        return jnp.stack([tr * c - ti * s, tr * s + ti * c],
                         axis=-1).reshape(t.shape)

    q, k = rope(q), rope(k)
    q = jnp.transpose(q, (0, 2, 1, 3))
    k = jnp.transpose(k, (0, 2, 1, 3))
    v = jnp.transpose(v, (0, 2, 1, 3))
    k = jnp.repeat(k, repeats, axis=1)
    v = jnp.repeat(v, repeats, axis=1)

    attn = jnp.einsum("bhqd,bhkd->bhqk", q, k) * scale
    mask = jnp.tril(jnp.ones((T, T), dtype=bool))
    attn = jnp.where(mask[None, None], attn, -jnp.inf)
    attn = jax.nn.softmax(attn, axis=-1)
    y = jnp.einsum("bhqk,bhkd->bhqd", attn, v)
    y = jnp.transpose(y, (0, 2, 1, 3)).reshape(B * T, n_head * head_dim)
    return (y @ params["wo"]).reshape(B, T, E)


# ------------------------------------- main -------------------------------------
if __name__ == "__main__":
    B, T = 2, 8
    embd_dim = 32
    n_head = 4
    n_kv_head = 2
    head_dim = 8
    rope_theta = 10000.0

    key = jax.random.PRNGKey(0)
    kx, kq, kk, kv, ko = jax.random.split(key, 5)

    x = jax.random.normal(kx, (B, T, embd_dim), dtype=jnp.float32)

    def init_w(k, fan_in, fan_out):
        bound = 1.0 / math.sqrt(fan_in)
        return jax.random.uniform(k, (fan_in, fan_out), minval=-bound,
                                  maxval=bound, dtype=jnp.float32)

    params = {
        "wq": init_w(kq, embd_dim, n_head * head_dim),
        "wk": init_w(kk, embd_dim, n_kv_head * head_dim),
        "wv": init_w(kv, embd_dim, n_kv_head * head_dim),
        "wo": init_w(ko, n_head * head_dim, embd_dim),
    }

    # freqs_cis equivalent: cos/sin of shape (T, head_dim // 2).
    inv_freq = 1.0 / (rope_theta ** (
        jnp.arange(0, head_dim, 2, dtype=jnp.float32) / head_dim))
    t = jnp.arange(T, dtype=jnp.float32)
    angles = jnp.outer(t, inv_freq)
    cos, sin = jnp.cos(angles), jnp.sin(angles)

    fwd = jax.jit(functools.partial(
        gqa_forward, n_head=n_head, n_kv_head=n_kv_head, head_dim=head_dim))
    out = jax.block_until_ready(fwd(params, x, cos, sin))

    assert out.shape == (B, T, embd_dim)
    assert bool(jnp.all(jnp.isfinite(out)))

    ref = reference_forward(params, x, cos, sin, n_head=n_head,
                            n_kv_head=n_kv_head, head_dim=head_dim)
    assert bool(jnp.allclose(out, ref, atol=5e-2, rtol=5e-2)), float(
        jnp.max(jnp.abs(out - ref)))
    print("KERNEL_OK")
</pallas_src>

<mosaic_0001>
module attributes {stable_mosaic.version = 11 : i64} {
  func.func @_matmul_kernel(%arg0: i32, %arg1: i32, %arg2: i32, %arg3: memref<16x32xf32, #tpu.memory_space<vmem>>, %arg4: memref<32x32xf32, #tpu.memory_space<vmem>>, %arg5: memref<16x32xf32, #tpu.memory_space<vmem>>, %arg6: memref<16x32xf32, #tpu.memory_space<vmem>>) attributes {dimension_semantics = [#tpu.dimension_semantics<parallel>, #tpu.dimension_semantics<parallel>, #tpu.dimension_semantics<arbitrary>], iteration_bounds = array<i64: 1, 1, 1>, scalar_prefetch = 0 : i64, scratch_operands = 1 : i64, tpu.core_type = #tpu.core_type<tc>, window_params = [{transform_indices = @transform_0, window_bounds = array<i64: 16, 32>}, {transform_indices = @transform_1, window_bounds = array<i64: 32, 32>}, {transform_indices = @transform_2, window_bounds = array<i64: 16, 32>}]} {
    %c0_i32 = arith.constant 0 : i32
    %0 = arith.cmpi eq, %arg2, %c0_i32 : i32
    %1 = arith.extui %0 : i1 to i32
    %c0_i32_0 = arith.constant 0 : i32
    %2 = arith.cmpi ne, %1, %c0_i32_0 : i32
    scf.if %2 {
      %cst_10 = arith.constant 0.000000e+00 : f32
      %12 = vector.broadcast %cst_10 : f32 to vector<16x32xf32>
      %c0_11 = arith.constant 0 : index
      %c0_12 = arith.constant 0 : index
      %13 = vector.load %arg6[%c0_11, %c0_12] : memref<16x32xf32, #tpu.memory_space<vmem>>, vector<16x32xf32>
      tpu.vector_store %arg6[%c0_11, %c0_12], %12 {strides = array<i32>} : memref<16x32xf32, #tpu.memory_space<vmem>>, vector<16x32xf32>,
    } else {
    }
    %c0 = arith.constant 0 : index
    %c0_1 = arith.constant 0 : index
    %3 = vector.load %arg6[%c0, %c0_1] : memref<16x32xf32, #tpu.memory_space<vmem>>, vector<16x32xf32>
    %c0_2 = arith.constant 0 : index
    %c0_3 = arith.constant 0 : index
    %4 = vector.load %arg3[%c0_2, %c0_3] : memref<16x32xf32, #tpu.memory_space<vmem>>, vector<16x32xf32>
    %c0_4 = arith.constant 0 : index
    %c0_5 = arith.constant 0 : index
    %5 = vector.load %arg4[%c0_4, %c0_5] : memref<32x32xf32, #tpu.memory_space<vmem>>, vector<32x32xf32>
    %cst = arith.constant dense<0.000000e+00> : vector<16x32xf32>
    %6 = tpu.matmul %4, %5, %cst {dimension_numbers = #tpu.dot_dimension_numbers<[1], [0], [0], [1], [0, 0, 1, 1], [], []>} : vector<16x32xf32>, vector<32x32xf32>, vector<16x32xf32> -> vector<16x32xf32>
    %7 = arith.addf %3, %6 : vector<16x32xf32>
    %c0_6 = arith.constant 0 : index
    %c0_7 = arith.constant 0 : index
    %8 = vector.load %arg6[%c0_6, %c0_7] : memref<16x32xf32, #tpu.memory_space<vmem>>, vector<16x32xf32>
    tpu.vector_store %arg6[%c0_6, %c0_7], %7 {strides = array<i32>} : memref<16x32xf32, #tpu.memory_space<vmem>>, vector<16x32xf32>,
    %c0_i32_8 = arith.constant 0 : i32
    %9 = arith.cmpi eq, %arg2, %c0_i32_8 : i32
    %10 = arith.extui %9 : i1 to i32
    %c0_i32_9 = arith.constant 0 : i32
    %11 = arith.cmpi ne, %10, %c0_i32_9 : i32
    scf.if %11 {
      %c0_10 = arith.constant 0 : index
      %c0_11 = arith.constant 0 : index
      %12 = vector.load %arg6[%c0_10, %c0_11] : memref<16x32xf32, #tpu.memory_space<vmem>>, vector<16x32xf32>
      %c0_12 = arith.constant 0 : index
      %c0_13 = arith.constant 0 : index
      %13 = vector.load %arg5[%c0_12, %c0_13] : memref<16x32xf32, #tpu.memory_space<vmem>>, vector<16x32xf32>
      tpu.vector_store %arg5[%c0_12, %c0_13], %12 {strides = array<i32>} : memref<16x32xf32, #tpu.memory_space<vmem>>, vector<16x32xf32>,
    } else {
    }
    return
  }
  func.func @transform_0(%arg0: i32, %arg1: i32, %arg2: i32) -> (i32, i32) {
    %c0_i32 = arith.constant 0 : i32
    return %arg0, %arg2 : i32, i32
  }
  func.func @transform_1(%arg0: i32, %arg1: i32, %arg2: i32) -> (i32, i32) {
    %c0_i32 = arith.constant 0 : i32
    return %arg2, %arg1 : i32, i32
  }
  func.func @transform_2(%arg0: i32, %arg1: i32, %arg2: i32) -> (i32, i32) {
    %c0_i32 = arith.constant 0 : i32
    return %arg0, %arg1 : i32, i32
  }
}

module attributes {stable_mosaic.version = 11 : i64} {
  func.func @_matmul_kernel(%arg0: i32, %arg1: i32, %arg2: i32, %arg3: memref<16x32xf32, #tpu.memory_space<vmem>>, %arg4: memref<32x64xf32, #tpu.memory_space<vmem>>, %arg5: memref<16x64xf32, #tpu.memory_space<vmem>>, %arg6: memref<16x64xf32, #tpu.memory_space<vmem>>) attributes {dimension_semantics = [#tpu.dimension_semantics<parallel>, #tpu.dimension_semantics<parallel>, #tpu.dimension_semantics<arbitrary>], iteration_bounds = array<i64: 1, 1, 1>, scalar_prefetch = 0 : i64, scratch_operands = 1 : i64, tpu.core_type = #tpu.core_type<tc>, window_params = [{transform_indices = @transform_0, window_bounds = array<i64: 16, 32>}, {transform_indices = @transform_1, window_bounds = array<i64: 32, 64>}, {transform_indices = @transform_2, window_bounds = array<i64: 16, 64>}]} {
    %c0_i32 = arith.constant 0 : i32
    %0 = arith.cmpi eq, %arg2, %c0_i32 : i32
    %1 = arith.extui %0 : i1 to i32
    %c0_i32_0 = arith.constant 0 : i32
    %2 = arith.cmpi ne, %1, %c0_i32_0 : i32
    scf.if %2 {
      %cst_10 = arith.constant 0.000000e+00 : f32
      %12 = vector.broadcast %cst_10 : f32 to vector<16x64xf32>
      %c0_11 = arith.constant 0 : index
      %c0_12 = arith.constant 0 : index
      %13 = vector.load %arg6[%c0_11, %c0_12] : memref<16x64xf32, #tpu.memory_space<vmem>>, vector<16x64xf32>
      tpu.vector_store %arg6[%c0_11, %c0_12], %12 {strides = array<i32>} : memref<16x64xf32, #tpu.memory_space<vmem>>, vector<16x64xf32>,
    } else {
    }
    %c0 = arith.constant 0 : index
    %c0_1 = arith.constant 0 : index
    %3 = vector.load %arg6[%c0, %c0_1] : memref<16x64xf32, #tpu.memory_space<vmem>>, vector<16x64xf32>
    %c0_2 = arith.constant 0 : index
    %c0_3 = arith.constant 0 : index
    %4 = vector.load %arg3[%c0_2, %c0_3] : memref<16x32xf32, #tpu.memory_space<vmem>>, vector<16x32xf32>
    %c0_4 = arith.constant 0 : index
    %c0_5 = arith.constant 0 : index
    %5 = vector.load %arg4[%c0_4, %c0_5] : memref<32x64xf32, #tpu.memory_space<vmem>>, vector<32x64xf32>
    %cst = arith.constant dense<0.000000e+00> : vector<16x64xf32>
    %6 = tpu.matmul %4, %5, %cst {dimension_numbers = #tpu.dot_dimension_numbers<[1], [0], [0], [1], [0, 0, 1, 1], [], []>} : vector<16x32xf32>, vector<32x64xf32>, vector<16x64xf32> -> vector<16x64xf32>
    %7 = arith.addf %3, %6 : vector<16x64xf32>
    %c0_6 = arith.constant 0 : index
    %c0_7 = arith.constant 0 : index
    %8 = vector.load %arg6[%c0_6, %c0_7] : memref<16x64xf32, #tpu.memory_space<vmem>>, vector<16x64xf32>
    tpu.vector_store %arg6[%c0_6, %c0_7], %7 {strides = array<i32>} : memref<16x64xf32, #tpu.memory_space<vmem>>, vector<16x64xf32>,
    %c0_i32_8 = arith.constant 0 : i32
    %9 = arith.cmpi eq, %arg2, %c0_i32_8 : i32
    %10 = arith.extui %9 : i1 to i32
    %c0_i32_9 = arith.constant 0 : i32
    %11 = arith.cmpi ne, %10, %c0_i32_9 : i32
    scf.if %11 {
      %c0_10 = arith.constant 0 : index
      %c0_11 = arith.constant 0 : index
      %12 = vector.load %arg6[%c0_10, %c0_11] : memref<16x64xf32, #tpu.memory_space<vmem>>, vector<16x64xf32>
      %c0_12 = arith.constant 0 : index
      %c0_13 = arith.constant 0 : index
      %13 = vector.load %arg5[%c0_12, %c0_13] : memref<16x64xf32, #tpu.memory_space<vmem>>, vector<16x64xf32>
      tpu.vector_store %arg5[%c0_12, %c0_13], %12 {strides = array<i32>} : memref<16x64xf32, #tpu.memory_space<vmem>>, vector<16x64xf32>,
    } else {
    }
    return
  }
  func.func @transform_0(%arg0: i32, %arg1: i32, %arg2: i32) -> (i32, i32) {
    %c0_i32 = arith.constant 0 : i32
    return %arg0, %arg2 : i32, i32
  }
  func.func @transform_1(%arg0: i32, %arg1: i32, %arg2: i32) -> (i32, i32) {
    %c0_i32 = arith.constant 0 : i32
    return %arg2, %arg1 : i32, i32
  }
  func.func @transform_2(%arg0: i32, %arg1: i32, %arg2: i32) -> (i32, i32) {
    %c0_i32 = arith.constant 0 : i32
    return %arg0, %arg1 : i32, i32
  }
}

module attributes {stable_mosaic.version = 11 : i64} {
  func.func @_flash_gqa_kernel(%arg0: i32, %arg1: i32, %arg2: i32, %arg3: i32, %arg4: memref<1x2x8x8xf32, #tpu.memory_space<vmem>>, %arg5: memref<1x1x8x8xf32, #tpu.memory_space<vmem>>, %arg6: memref<1x1x8x8xf32, #tpu.memory_space<vmem>>, %arg7: memref<8x8xf32, #tpu.memory_space<vmem>>, %arg8: memref<8x8xf32, #tpu.memory_space<vmem>>, %arg9: memref<8x8xf32, #tpu.memory_space<vmem>>, %arg10: memref<8x8xf32, #tpu.memory_space<vmem>>, %arg11: memref<8x8xf32, #tpu.memory_space<vmem>>, %arg12: memref<1x1x8x16xf32, #tpu.memory_space<vmem>>, %arg13: memref<16x1xf32, #tpu.memory_space<vmem>>, %arg14: memref<16x1xf32, #tpu.memory_space<vmem>>, %arg15: memref<16x8xf32, #tpu.memory_space<vmem>>) attributes {dimension_semantics = [#tpu.dimension_semantics<parallel>, #tpu.dimension_semantics<parallel>, #tpu.dimension_semantics<parallel>, #tpu.dimension_semantics<arbitrary>], iteration_bounds = array<i64: 2, 2, 1, 1>, scalar_prefetch = 0 : i64, scratch_operands = 3 : i64, tpu.core_type = #tpu.core_type<tc>, window_params = [{transform_indices = @transform_0, window_bounds = array<i64: 1, 2, 8, 8>}, {transform_indices = @transform_1, window_bounds = array<i64: 1, 1, 8, 8>}, {transform_indices = @transform_2, window_bounds = array<i64: 1, 1, 8, 8>}, {transform_indices = @transform_3, window_bounds = array<i64: 8, 8>}, {transform_indices = @transform_4, window_bounds = array<i64: 8, 8>}, {transform_indices = @transform_5, window_bounds = array<i64: 8, 8>}, {transform_indices = @transform_6, window_bounds = array<i64: 8, 8>}, {pipeline_mode = #tpu.pipeline_mode<synchronous>, transform_indices = @transform_7, window_bounds = array<i64: 8, 8>}, {transform_indices = @transform_8, window_bounds = array<i64: 1, 1, 8, 16>}]} {
    %c0_i32 = arith.constant 0 : i32
    %0 = arith.cmpi eq, %arg3, %c0_i32 : i32
    %1 = arith.extui %0 : i1 to i32
    %c0_i32_0 = arith.constant 0 : i32
    %2 = arith.cmpi ne, %1, %c0_i32_0 : i32
    scf.if %2 {
      %cst = arith.constant 0xFF800000 : f32
      %12 = vector.broadcast %cst : f32 to vector<16x1xf32>
      %c0 = arith.constant 0 : index
      %c0_5 = arith.constant 0 : index
      %13 = vector.load %arg13[%c0, %c0_5] : memref<16x1xf32, #tpu.memory_space<vmem>>, vector<16x1xf32>
      tpu.vector_store %arg13[%c0, %c0_5], %12 {strides = array<i32>} : memref<16x1xf32, #tpu.memory_space<vmem>>, vector<16x1xf32>,
      %cst_6 = arith.constant 0.000000e+00 : f32
      %14 = vector.broadcast %cst_6 : f32 to vector<16x1xf32>
      %c0_7 = arith.constant 0 : index
      %c0_8 = arith.constant 0 : index
      %15 = vector.load %arg14[%c0_7, %c0_8] : memref<16x1xf32, #tpu.memory_space<vmem>>, vector<16x1xf32>
      tpu.vector_store %arg14[%c0_7, %c0_8], %14 {strides = array<i32>} : memref<16x1xf32, #tpu.memory_space<vmem>>, vector<16x1xf32>,
      %cst_9 = arith.constant 0.000000e+00 : f32
      %16 = vector.broadcast %cst_9 : f32 to vector<16x8xf32>
      %c0_10 = arith.constant 0 : index
      %c0_11 = arith.constant 0 : index
      %17 = vector.load %arg15[%c0_10, %c0_11] : memref<16x8xf32, #tpu.memory_space<vmem>>, vector<16x8xf32>
      tpu.vector_store %arg15[%c0_10, %c0_11], %16 {strides = array<i32>} : memref<16x8xf32, #tpu.memory_space<vmem>>, vector<16x8xf32>,
    } else {
    }
    %c8_i32 = arith.constant 8 : i32
    %3 = arith.muli %arg3, %c8_i32 : i32
    %c8_i32_1 = arith.constant 8 : i32
    %4 = arith.muli %arg2, %c8_i32_1 : i32
    %c7_i32 = arith.constant 7 : i32
    %5 = arith.addi %4, %c7_i32 : i32
    %6 = arith.cmpi sle, %3, %5 : i32
    %7 = arith.extui %6 : i1 to i32
    %c0_i32_2 = arith.constant 0 : i32
    %8 = arith.cmpi ne, %7, %c0_i32_2 : i32
    scf.if %8 {
      %c0 = arith.constant 0 : index
      %c0_5 = arith.constant 0 : index
      %12 = vector.load %arg11[%c0, %c0_5] : memref<8x8xf32, #tpu.memory_space<vmem>>, vector<8x8xf32>
      %c0_6 = arith.constant 0 : index
      %c0_7 = arith.constant 0 : index
      %c0_8 = arith.constant 0 : index
      %c0_9 = arith.constant 0 : index
      %13 = vector.load %arg4[%c0_6, %c0_7, %c0_8, %c0_9] : memref<1x2x8x8xf32, #tpu.memory_space<vmem>>, vector<1x2x8x8xf32>
      %14 = vector.shape_cast %13 : vector<1x2x8x8xf32> to vector<2x8x8xf32>
      %15 = vector.shape_cast %14 : vector<2x8x8xf32> to vector<16x8xf32>
      %cst = arith.constant dense<0.000000e+00> : vector<16x8xf32>
      %16 = tpu.matmul %15, %12, %cst {dimension_numbers = #tpu.dot_dimension_numbers<[1], [0], [0], [1], [0, 0, 1, 1], [], []>} : vector<16x8xf32>, vector<8x8xf32>, vector<16x8xf32> -> vector<16x8xf32>
      %17 = vector.shape_cast %16 : vector<16x8xf32> to vector<2x8x8xf32>
      %c0_10 = arith.constant 0 : index
      %c0_11 = arith.constant 0 : index
      %18 = vector.load %arg7[%c0_10, %c0_11] : memref<8x8xf32, #tpu.memory_space<vmem>>, vector<8x8xf32>
      %19 = vector.shape_cast %18 : vector<8x8xf32> to vector<1x8x8xf32>
      %c0_12 = arith.constant 0 : index
      %c0_13 = arith.constant 0 : index
      %20 = vector.load %arg8[%c0_12, %c0_13] : memref<8x8xf32, #tpu.memory_space<vmem>>, vector<8x8xf32>
      %21 = vector.shape_cast %20 : vector<8x8xf32> to vector<1x8x8xf32>
      %22 = vector.broadcast %19 : vector<1x8x8xf32> to vector<2x8x8xf32>
      %23 = arith.mulf %14, %22 : vector<2x8x8xf32>
      %24 = vector.broadcast %21 : vector<1x8x8xf32> to vector<2x8x8xf32>
      %25 = arith.mulf %17, %24 : vector<2x8x8xf32>
      %26 = arith.addf %23, %25 : vector<2x8x8xf32>
      %cst_14 = arith.constant 0.353553385 : f32
      %27 = vector.broadcast %cst_14 : f32 to vector<2x8x8xf32>
      %28 = arith.mulf %26, %27 : vector<2x8x8xf32>
      %29 = vector.shape_cast %28 : vector<2x8x8xf32> to vector<16x8xf32>
      %c0_15 = arith.constant 0 : index
      %c0_16 = arith.constant 0 : index
      %c0_17 = arith.constant 0 : index
      %c0_18 = arith.constant 0 : index
      %30 = vector.load %arg5[%c0_15, %c0_16, %c0_17, %c0_18] : memref<1x1x8x8xf32, #tpu.memory_space<vmem>>, vector<1x1x8x8xf32>
      %31 = vector.shape_cast %30 : vector<1x1x8x8xf32> to vector<8x8xf32>
      %cst_19 = arith.constant dense<0.000000e+00> : vector<8x8xf32>
      %32 = tpu.matmul %31, %12, %cst_19 {dimension_numbers = #tpu.dot_dimension_numbers<[1], [0], [0], [1], [0, 0, 1, 1], [], []>} : vector<8x8xf32>, vector<8x8xf32>, vector<8x8xf32> -> vector<8x8xf32>
      %c0_20 = arith.constant 0 : index
      %c0_21 = arith.constant 0 : index
      %33 = vector.load %arg9[%c0_20, %c0_21] : memref<8x8xf32, #tpu.memory_space<vmem>>, vector<8x8xf32>
      %34 = arith.mulf %31, %33 : vector<8x8xf32>
      %c0_22 = arith.constant 0 : index
      %c0_23 = arith.constant 0 : index
      %35 = vector.load %arg10[%c0_22, %c0_23] : memref<8x8xf32, #tpu.memory_space<vmem>>, vector<8x8xf32>
      %36 = arith.mulf %32, %35 : vector<8x8xf32>
      %37 = arith.addf %34, %36 : vector<8x8xf32>
      %cst_24 = arith.constant dense<0.000000e+00> : vector<16x8xf32>
      %38 = tpu.matmul %29, %37, %cst_24 {dimension_numbers = #tpu.dot_dimension_numbers<[1], [1], [0], [0], [0, 0, 1, 0], [], []>} : vector<16x8xf32>, vector<8x8xf32>, vector<16x8xf32> -> vector<16x8xf32>
      %39 = tpu.iota {dimensions = array<i32: 0>} : vector<16x8xi32>
      %40 = tpu.iota {dimensions = array<i32: 1>} : vector<16x8xi32>
      %c8_i32_25 = arith.constant 8 : i32
      %41 = arith.muli %arg2, %c8_i32_25 : i32
      %c8_i32_26 = arith.constant 8 : i32
      %c0_i32_27 = arith.constant 0 : i32
      %42 = arith.cmpi eq, %c8_i32_26, %c0_i32_27 : i32
      %c1_i32 = arith.constant 1 : i32
      %43 = arith.select %42, %c1_i32, %c8_i32_26 : i32
      %44 = vector.broadcast %43 : i32 to vector<16x8xi32>
      %45 = arith.remsi %39, %44 : vector<16x8xi32>
      %c0_i32_28 = arith.constant 0 : i32
      %46 = vector.broadcast %c0_i32_28 : i32 to vector<16x8xi32>
      %47 = arith.cmpi ne, %45, %46 : vector<16x8xi32>
      %c0_i32_29 = arith.constant 0 : i32
      %48 = vector.broadcast %c0_i32_29 : i32 to vector<16x8xi32>
      %49 = arith.cmpi slt, %45, %48 : vector<16x8xi32>
      %c0_i32_30 = arith.constant 0 : i32
      %50 = arith.cmpi slt, %43, %c0_i32_30 : i32
      %51 = vector.broadcast %50 : i1 to vector<16x8xi1>
      %52 = vector.broadcast %51 : vector<16x8xi1> to vector<16x8xi1>
      %53 = arith.xori %49, %52 : vector<16x8xi1>
      %54 = arith.andi %53, %47 : vector<16x8xi1>
      %55 = vector.broadcast %43 : i32 to vector<16x8xi32>
      %56 = arith.addi %45, %55 : vector<16x8xi32>
      %57 = arith.select %54, %56, %45 : vector<16x8xi1>, vector<16x8xi32>
      %58 = vector.broadcast %41 : i32 to vector<16x8xi32>
      %59 = arith.addi %58, %57 : vector<16x8xi32>
      %c8_i32_31 = arith.constant 8 : i32
      %60 = arith.muli %arg3, %c8_i32_31 : i32
      %61 = vector.broadcast %60 : i32 to vector<16x8xi32>
      %62 = arith.addi %61, %40 : vector<16x8xi32>
      %63 = arith.cmpi sle, %62, %59 : vector<16x8xi32>
      %cst_32 = arith.constant 0xFF800000 : f32
      %64 = vector.broadcast %cst_32 : f32 to vector<16x8xf32>
      %65 = arith.select %63, %38, %64 : vector<16x8xi1>, vector<16x8xf32>
      %c0_33 = arith.constant 0 : index
      %c0_34 = arith.constant 0 : index
      %66 = vector.load %arg13[%c0_33, %c0_34] : memref<16x1xf32, #tpu.memory_space<vmem>>, vector<16x1xf32>
      %cst_35 = arith.constant dense<0xFF800000> : vector<16xf32>
      %67 = vector.multi_reduction <maximumf>, %65, %cst_35 [1] : vector<16x8xf32> to vector<16xf32>
      %68 = vector.shape_cast %67 : vector<16xf32> to vector<16x1xf32>
      %69 = arith.maximumf %66, %68 : vector<16x1xf32>
      %70 = arith.subf %66, %69 : vector<16x1xf32>
      %71 = math.exp %70 : vector<16x1xf32>
      %72 = vector.broadcast %69 : vector<16x1xf32> to vector<16x8xf32>
      %73 = arith.subf %65, %72 : vector<16x8xf32>
      %74 = math.exp %73 : vector<16x8xf32>
      %c0_36 = arith.constant 0 : index
      %c0_37 = arith.constant 0 : index
      %75 = vector.load %arg14[%c0_36, %c0_37] : memref<16x1xf32, #tpu.memory_space<vmem>>, vector<16x1xf32>
      %76 = arith.mulf %71, %75 : vector<16x1xf32>
      %cst_38 = arith.constant dense<0.000000e+00> : vector<16xf32>
      %77 = vector.multi_reduction <add>, %74, %cst_38 [1] : vector<16x8xf32> to vector<16xf32>
      %78 = vector.shape_cast %77 : vector<16xf32> to vector<16x1xf32>
      %79 = arith.addf %76, %78 : vector<16x1xf32>
      %c0_39 = arith.constant 0 : index
      %c0_40 = arith.constant 0 : index
      %80 = vector.load %arg14[%c0_39, %c0_40] : memref<16x1xf32, #tpu.memory_space<vmem>>, vector<16x1xf32>
      tpu.vector_store %arg14[%c0_39, %c0_40], %79 {strides = array<i32>} : memref<16x1xf32, #tpu.memory_space<vmem>>, vector<16x1xf32>,
      %c0_41 = arith.constant 0 : index
      %c0_42 = arith.constant 0 : index
      %81 = vector.load %arg15[%c0_41, %c0_42] : memref<16x8xf32, #tpu.memory_space<vmem>>, vector<16x8xf32>
      %82 = vector.broadcast %71 : vector<16x1xf32> to vector<16x8xf32>
      %83 = arith.mulf %82, %81 : vector<16x8xf32>
      %c0_43 = arith.constant 0 : index
      %c0_44 = arith.constant 0 : index
      %c0_45 = arith.constant 0 : index
      %c0_46 = arith.constant 0 : index
      %84 = vector.load %arg6[%c0_43, %c0_44, %c0_45, %c0_46] : memref<1x1x8x8xf32, #tpu.memory_space<vmem>>, vector<1x1x8x8xf32>
      %85 = vector.shape_cast %84 : vector<1x1x8x8xf32> to vector<8x8xf32>
      %cst_47 = arith.constant dense<0.000000e+00> : vector<16x8xf32>
      %86 = tpu.matmul %74, %85, %cst_47 {dimension_numbers = #tpu.dot_dimension_numbers<[1], [0], [0], [1], [0, 0, 1, 1], [], []>} : vector<16x8xf32>, vector<8x8xf32>, vector<16x8xf32> -> vector<16x8xf32>
      %87 = arith.addf %83, %86 : vector<16x8xf32>
      %c0_48 = arith.constant 0 : index
      %c0_49 = arith.constant 0 : index
      %88 = vector.load %arg15[%c0_48, %c0_49] : memref<16x8xf32, #tpu.memory_space<vmem>>, vector<16x8xf32>
      tpu.vector_store %arg15[%c0_48, %c0_49], %87 {strides = array<i32>} : memref<16x8xf32, #tpu.memory_space<vmem>>, vector<16x8xf32>,
      %c0_50 = arith.constant 0 : index
      %c0_51 = arith.constant 0 : index
      %89 = vector.load %arg13[%c0_50, %c0_51] : memref<16x1xf32, #tpu.memory_space<vmem>>, vector<16x1xf32>
      tpu.vector_store %arg13[%c0_50, %c0_51], %69 {strides = array<i32>} : memref<16x1xf32, #tpu.memory_space<vmem>>, vector<16x1xf32>,
    } else {
    }
    %c0_i32_3 = arith.constant 0 : i32
    %9 = arith.cmpi eq, %arg3, %c0_i32_3 : i32
    %10 = arith.extui %9 : i1 to i32
    %c0_i32_4 = arith.constant 0 : i32
    %11 = arith.cmpi ne, %10, %c0_i32_4 : i32
    scf.if %11 {
      %c0 = arith.constant 0 : index
      %c0_5 = arith.constant 0 : index
      %12 = vector.load %arg14[%c0, %c0_5] : memref<16x1xf32, #tpu.memory_space<vmem>>, vector<16x1xf32>
      %13 = tpu.reciprocal %12 {approx = true} : vector<16x1xf32> -> vector<16x1xf32>
      %c0_6 = arith.constant 0 : index
      %c0_7 = arith.constant 0 : index
      %14 = vector.load %arg15[%c0_6, %c0_7] : memref<16x8xf32, #tpu.memory_space<vmem>>, vector<16x8xf32>
      %15 = vector.broadcast %13 : vector<16x1xf32> to vector<16x8xf32>
      %16 = arith.mulf %14, %15 : vector<16x8xf32>
      %17 = vector.shape_cast %16 : vector<16x8xf32> to vector<2x8x8xf32>
      %18 = vector.extract_strided_slice %17 {offsets = [0, 0, 0], sizes = [1, 8, 8], strides = [1, 1, 1]} : vector<2x8x8xf32> to vector<1x8x8xf32>
      %19 = vector.shape_cast %18 : vector<1x8x8xf32> to vector<8x8xf32>
      %c0_8 = arith.constant 0 : index
      %c0_9 = arith.constant 0 : index
      %c0_10 = arith.constant 0 : index
      %c0_11 = arith.constant 0 : index
      %20 = vector.load %arg12[%c0_8, %c0_9, %c0_10, %c0_11] : memref<1x1x8x16xf32, #tpu.memory_space<vmem>>, vector<1x1x8x8xf32>
      %21 = vector.shape_cast %20 : vector<1x1x8x8xf32> to vector<8x8xf32>
      %22 = vector.shape_cast %19 : vector<8x8xf32> to vector<1x1x8x8xf32>
      tpu.vector_store %arg12[%c0_8, %c0_9, %c0_10, %c0_11], %22 {strides = array<i32>} : memref<1x1x8x16xf32, #tpu.memory_space<vmem>>, vector<1x1x8x8xf32>,
      %23 = vector.extract_strided_slice %17 {offsets = [1, 0, 0], sizes = [1, 8, 8], strides = [1, 1, 1]} : vector<2x8x8xf32> to vector<1x8x8xf32>
      %24 = vector.shape_cast %23 : vector<1x8x8xf32> to vector<8x8xf32>
      %c0_12 = arith.constant 0 : index
      %c0_13 = arith.constant 0 : index
      %c0_14 = arith.constant 0 : index
      %c8 = arith.constant 8 : index
      %25 = vector.load %arg12[%c0_12, %c0_13, %c0_14, %c8] : memref<1x1x8x16xf32, #tpu.memory_space<vmem>>, vector<1x1x8x8xf32>
      %26 = vector.shape_cast %25 : vector<1x1x8x8xf32> to vector<8x8xf32>
      %27 = vector.shape_cast %24 : vector<8x8xf32> to vector<1x1x8x8xf32>
      tpu.vector_store %arg12[%c0_12, %c0_13, %c0_14, %c8], %27 {strides = array<i32>} : memref<1x1x8x16xf32, #tpu.memory_space<vmem>>, vector<1x1x8x8xf32>,
    } else {
    }
    return
  }
  func.func @transform_0(%arg0: i32, %arg1: i32, %arg2: i32, %arg3: i32) -> (i32, i32, i32, i32) {
    %c0_i32 = arith.constant 0 : i32
    %c0_i32_0 = arith.constant 0 : i32
    return %arg0, %arg1, %arg2, %c0_i32 : i32, i32, i32, i32
  }
  func.func @transform_1(%arg0: i32, %arg1: i32, %arg2: i32, %arg3: i32) -> (i32, i32, i32, i32) {
    %c0_i32 = arith.constant 0 : i32
    %c0_i32_0 = arith.constant 0 : i32
    return %arg0, %arg1, %arg3, %c0_i32 : i32, i32, i32, i32
  }
  func.func @transform_2(%arg0: i32, %arg1: i32, %arg2: i32, %arg3: i32) -> (i32, i32, i32, i32) {
    %c0_i32 = arith.constant 0 : i32
    %c0_i32_0 = arith.constant 0 : i32
    return %arg0, %arg1, %arg3, %c0_i32 : i32, i32, i32, i32
  }
  func.func @transform_3(%arg0: i32, %arg1: i32, %arg2: i32, %arg3: i32) -> (i32, i32) {
    %c0_i32 = arith.constant 0 : i32
    %c0_i32_0 = arith.constant 0 : i32
    return %arg2, %c0_i32 : i32, i32
  }
  func.func @transform_4(%arg0: i32, %arg1: i32, %arg2: i32, %arg3: i32) -> (i32, i32) {
    %c0_i32 = arith.constant 0 : i32
    %c0_i32_0 = arith.constant 0 : i32
    return %arg2, %c0_i32 : i32, i32
  }
  func.func @transform_5(%arg0: i32, %arg1: i32, %arg2: i32, %arg3: i32) -> (i32, i32) {
    %c0_i32 = arith.constant 0 : i32
    %c0_i32_0 = arith.constant 0 : i32
    return %arg3, %c0_i32 : i32, i32
  }
  func.func @transform_6(%arg0: i32, %arg1: i32, %arg2: i32, %arg3: i32) -> (i32, i32) {
    %c0_i32 = arith.constant 0 : i32
    %c0_i32_0 = arith.constant 0 : i32
    return %arg3, %c0_i32 : i32, i32
  }
  func.func @transform_7(%arg0: i32, %arg1: i32, %arg2: i32, %arg3: i32) -> (i32, i32) {
    %c0_i32 = arith.constant 0 : i32
    %c0_i32_0 = arith.constant 0 : i32
    %c0_i32_1 = arith.constant 0 : i32
    return %c0_i32, %c0_i32_0 : i32, i32
  }
  func.func @transform_8(%arg0: i32, %arg1: i32, %arg2: i32, %arg3: i32) -> (i32, i32, i32, i32) {
    %c0_i32 = arith.constant 0 : i32
    %c0_i32_0 = arith.constant 0 : i32
    return %arg0, %arg1, %arg2, %c0_i32 : i32, i32, i32, i32
  }
}

</mosaic_0001>

<bundles_post_ra>
// kernel: gqa_forward.3
= control target key start
LH: loop header
LB: loop body
LE: loop exit
PB: predicated region body
PF: predicated region fallthrough
CT: control target
= control target key end

     0   :  { %vm15_vm0 = vcmask 523264   ;;  %v79_v2 = vmov 0.0   ;;  %vm26_vm1 = vcmask 261120   ;;  %s125_s1 = inlined_call_operand.vmem [shape: f32[32,64], index: 1, kind: input, shape index: {}]   ;;  %s126_s0 = inlined_call_operand.vmem [shape: f32[16,32], index: 0, kind: input, shape index: {}]   ;;  %s127_s2 = inlined_call_operand.vmem [shape: f32[16,64], index: 2, kind: output, shape index: {}]  }
   0x1   :  { %v25_v0 = vld [vmem:[%s125_s1 + $0x18] sm:$0xff]  ;;  %v24_v1 = vld [vmem:[%s125_s1 + $0x10] sm:$0xff]  ;;  %16 = vst.msk [vmem:[#allocation2] sm:$0xff] %vm15_vm0, %v79_v2  ;;  %v23_v3 = vld [vmem:[%s125_s1 + $0x8] sm:$0xff] }
   0x2   :  { %45 = vmatpush.msra.mxu0 %v25_v0  ;;  %74 = vmatpush.msra.mxu1 %v25_v0  ;;  %17 = vst.msk [vmem:[#allocation2 + $0x8] sm:$0xff] %vm15_vm0, %v79_v2  ;;  %v22_v4 = vld [vmem:[%s125_s1] sm:$0xff]  ;;  %v21_v6 = vld [vmem:[%s126_s0 + $0x8] sm:$0xff] }
   0x3   :  { %v20_v5 = vld [vmem:[%s126_s0] sm:$0xff] }
   0x4   :  { %46 = vmatpush.msra.mxu0 %v24_v1  ;;  %75 = vmatpush.msra.mxu1 %v24_v1 }
   0x6   :  { %47 = vmatpush.msra.mxu0 %v23_v3  ;;  %76 = vmatpush.msra.mxu1 %v23_v3 }
   0x8   :  { %48 = vmatpush.msra.mxu0 %v22_v4  ;;  %77 = vmatpush.msra.mxu1 %v22_v4  ;;  %v18_v7 = vld [vmem:[#allocation2] sm:$0xff] }
   0x9   :  { %72 = vmatmul.msk.f32.vlgmr.msra.gmra.mxu0 %vm26_vm1, %v20_v5  ;;  %73 = vmatmul.msk.f32.vlgmr.msra.gmra.mxu1 %vm26_vm1, %v21_v6  ;;  %v19_v8 = vld [vmem:[#allocation2 + $0x8] sm:$0xff] }
  0x86   :  { %v50_v9 = vpop.f32.mrf.mxu0  ;;  %v53_v10 = vpop.f32.mrf.mxu1 }
  0x87   :  { %v56_v11 = vadd.f32 %v50_v9, %v18_v7  ;;  %v57_v12 = vadd.f32 %v53_v10, %v19_v8 }
  0x89   :  { %59 = vst.msk [vmem:[#allocation2] sm:$0xff] %vm15_vm0, %v56_v11 }
  0x8a   :  { %60 = vst.msk [vmem:[#allocation2 + $0x8] sm:$0xff] %vm15_vm0, %v57_v12 }
  0x90   :  { %v64_v13 = vld [vmem:[#allocation2] sm:$0xff] }
  0x91   :  { %66 = vst.msk [vmem:[%s127_s2] sm:$0xff] %vm15_vm0, %v64_v13  ;;  %v65_v14 = vld [vmem:[#allocation2 + $0x8] sm:$0xff] }
  0x92   :  { %67 = vst.msk [vmem:[%s127_s2 + $0x8] sm:$0xff] %vm15_vm0, %v65_v14 }

// kernel: gqa_forward.5
= control target key start
LH: loop header
LB: loop body
LE: loop exit
PB: predicated region body
PF: predicated region fallthrough
CT: control target
= control target key end

     0   :  { %vm16_vm0 = vcmask 261120   ;;  %v122_v2 = vmov 0.0   ;;  %s170_s0 = inlined_call_operand.vmem [shape: f32[16,32], index: 0, kind: input, shape index: {}]   ;;  %s171_s1 = inlined_call_operand.vmem [shape: f32[32,32], index: 1, kind: input, shape index: {}]   ;;  %s172_s2 = inlined_call_operand.hbm [shape: f32[16,32], index: 2, kind: output, shape index: {}]  }
   0x1   :  { %v26_v0 = vld [vmem:[%s171_s1 + $0x18] sm:$0xff]  ;;  %v25_v1 = vld [vmem:[%s171_s1 + $0x10] sm:$0xff]  ;;  %17 = vst.msk [vmem:[#allocation2] sm:$0xff] %vm16_vm0, %v122_v2  ;;  %v24_v3 = vld [vmem:[%s171_s1 + $0x8] sm:$0xff] }
   0x2   :  { %46 = vmatpush.msra.mxu0 %v26_v0  ;;  %88 = vmatpush.msra.mxu1 %v26_v0  ;;  %18 = vst.msk [vmem:[#allocation2 + $0x8] sm:$0xff] %vm16_vm0, %v122_v2 }
   0x3   :  { %7 = vsyncpa [#allocation4], 0  ;;  %v23_v4 = vld [vmem:[%s171_s1] sm:$0xff]  ;;  %v22_v6 = vld [vmem:[%s170_s0 + $0x8] sm:$0xff]  ;;  %s123_s1 = smov [#allocation3]   ;;  %s74_s23 = sshll.u32 %s172_s2, 4  ;;  %s75_s23 = int_to_ptr.hbm [resolvable:$true] %s74_s23 }
   0x4   :  { %47 = vmatpush.msra.mxu0 %v25_v1  ;;  %89 = vmatpush.msra.mxu1 %v25_v1  ;;  %v21_v5 = vld [vmem:[%s170_s0] sm:$0xff]  ;;  %s72_s21 = sshll.u32 %s123_s1, 4  ;;  %s124_s24 = smov 128   ;;  %s73_s21 = int_to_ptr.vmem [resolvable:$true] %s72_s21 }
   0x5   :  { %s125_s25 = smov 8  }
   0x6   :  { %48 = vmatpush.msra.mxu0 %v24_v3  ;;  %90 = vmatpush.msra.mxu1 %v24_v3 }
   0x8   :  { %49 = vmatpush.msra.mxu0 %v23_v4  ;;  %91 = vmatpush.msra.mxu1 %v23_v4  ;;  %v19_v7 = vld [vmem:[#allocation2] sm:$0xff] }
   0x9   :  { %86 = vmatmul.msk.f32.vlgmr.msra.gmra.mxu0 %vm16_vm0, %v21_v5  ;;  %87 = vmatmul.msk.f32.vlgmr.msra.gmra.mxu1 %vm16_vm0, %v22_v6  ;;  %v20_v8 = vld [vmem:[#allocation2 + $0x8] sm:$0xff] }
  0x86   :  { %v51_v9 = vpop.f32.mrf.mxu0  ;;  %v54_v10 = vpop.f32.mrf.mxu1 }
  0x87   :  { %v57_v11 = vadd.f32 %v51_v9, %v19_v7  ;;  %v58_v12 = vadd.f32 %v54_v10, %v20_v8 }
  0x89   :  { %59 = vst.msk [vmem:[#allocation2] sm:$0xff] %vm16_vm0, %v57_v11 }
  0x8a   :  { %60 = vst.msk [vmem:[#allocation2 + $0x8] sm:$0xff] %vm16_vm0, %v58_v12 }
  0x90   :  { %v64_v13 = vld [vmem:[#allocation2] sm:$0xff] }
  0x91   :  { %v65_v14 = vld [vmem:[#allocation2 + $0x8] sm:$0xff]  ;;  %66 = vst.msk [vmem:[#allocation3] sm:$0xff] %vm16_vm0, %v64_v13 }
  0x92   :  { %67 = vst.msk [vmem:[#allocation3 + $0x8] sm:$0xff] %vm16_vm0, %v65_v14 }
  0x93   :  { %80 = dma.vmem_to_hbm [thread:$0]  %s73_s21, 256, %s75_s23, [#allocation4], %s124_s24, %s124_s24, %s125_s25  }
  0x94   :  { %120 = dma.done.wait [#allocation4], 256  }
  0x95   :  { %121 = vsyncadd [#allocation4], 4294967040 }
  0x96   :  { %85 = vsyncpa [#allocation4], 1 }

// kernel: gqa_forward.4
= control target key start
LH: loop header
LB: loop body
LE: loop exit
PB: predicated region body
PF: predicated region fallthrough
CT: control target
= control target key end

     0   :  { %s1199_s27 = smov 0   ;;  %s1201_s28 = smov 0   ;;  %s1307_s0 = inlined_call_operand.vmem [shape: f32[2,4,8,8], index: 0, kind: input, shape index: {}]   ;;  %s1308_s1 = inlined_call_operand.vmem [shape: f32[2,2,8,8], index: 1, kind: input, shape index: {}]   ;;  %s1309_s2 = inlined_call_operand.vmem [shape: f32[2,2,8,8], index: 2, kind: input, shape index: {}]   ;;  %s1310_s3 = inlined_call_operand.vmem [shape: f32[8,8], index: 3, kind: input, shape index: {}, may-alias: {3,5}]   ;;  %s1311_s4 = inlined_call_operand.vmem [shape: f32[8,8], index: 4, kind: input, shape index: {}, may-alias: {4,6}]   ;;  %s1312_s5 = inlined_call_operand.vmem [shape: f32[8,8], index: 5, kind: input, shape index: {}, may-alias: {3,5}]   ;;  %s1313_s6 = inlined_call_operand.vmem [shape: f32[8,8], index: 6, kind: input, shape index: {}, may-alias: {4,6}]   ;;  %s1314_s7 = inlined_call_operand.vmem [shape: f32[8,8], index: 7, kind: input, shape index: {}]   ;;  %s1315_s8 = inlined_call_operand.vmem [shape: f32[2,2,8,16], index: 8, kind: output, shape index: {}]  }
   0x1   :  { %s1203_s29 = smov 0   ;;  %s1205_s30 = smov 0  }
   0x2   :  { %s1207_s9 = smov 0  }
   0x3 LB: > { %s40_s10 = sadd.s32 1, %s1140_s29  ;;  %s44_s11 = sadd.s32 1, %s1144_s30  ;;  %s1148_s9 = sphi %s1207_s9, %s18_s9   ;;  %s1144_s30 = sphi %s1205_s30, %s1319_s30   ;;  %s1140_s29 = sphi %s1203_s29, %s1318_s29   ;;  %s1136_s28 = sphi %s1201_s28, %s1317_s28   ;;  %s1132_s27 = sphi %s1199_s27, %s1316_s27  }
   0x4   : > { %p42_p0 = scmp.ge.s32.totalorder %s40_s10, 2  ;;  %p1030_p1 = scmp.ge.s32.totalorder %s1148_s9, 1 }
   0x5   : > { %p380_p2 = scmp.lt.s32.totalorder %s1148_s9, 5 }
   0x6   : > { %s1321_s10 = smov (%p42_p0, %s40_s10), 0  ;;  %s1323_s11 = smov (!%p42_p0, %s44_s11), %s1144_s30 }
   0x7   : > { %p381_p3 = pnand %p1030_p1, %p380_p2  ;;  %p46_p4 = scmp.ge.s32.totalorder %s1323_s11, 2 }
   0x8   : > { %s1031_s14 = sshll.u32 (!%p381_p3), %s1132_s27, 1  ;;  %p466_p5 = scmp.lt.s32.totalorder (!%p381_p3), %s1136_s28, 1 }
   0x9   : > { %s1325_s11 = smov (%p46_p4, %s1323_s11), 0  ;;  %384 = sbr.rel (%p381_p3) target bundleno = 905 (0x389), region = 52 }
   0xa   : > { %p468_p6 = scmp.lt.s32.totalorder (!%p381_p3), %s1031_s14, 3  ;;  %p480_p7 = scmp.lt.s32.totalorder (!%p381_p3), %s1132_s27, 1 }
   0xe   : > { %v546_v0 = vld [vmem:[%s1314_s7] sm:$0xff]  ;;  %s1327_s28 = smov (!%p466_p5, %s1136_s28), 1  ;;  %s1329_s14 = smov (!%p468_p6, %s1031_s14), 3  ;;  %vm536_vm0 = vcmask 64512   ;;  %vm531_vm1 = vcmask 7168   ;;  %v1150_v22 = vmov -inf   ;;  %v650_v23 = vlaneseq }
   0xf   : > { %571 = vmatpush.msra.mxu0 %v546_v0  ;;  %608 = vmatpush.msra.mxu1 %v546_v0  ;;  %s1032_s15 = sshll.u32 %s1327_s28, 2  ;;  %s1034_s21 = sshll.u32 %s1327_s28, 1  ;;  %v579_v4 = vld [vmem:[%s1310_s3] sm:$0xff]  ;;  %532 = vst.msk [vmem:[#allocation2] sm:$0xff] %vm531_vm1, %v1150_v22  ;;  %v1151_v35 = vmov 0   ;;  %v1152_v36 = vmov 0.0  }
  0x10   : > { %s474_s16 = sadd.s32 %s1032_s15, %s1329_s14  ;;  %s1331_s27 = smov (!%p480_p7, %s1132_s27), 1  ;;  %v580_v5 = vld [vmem:[%s1311_s4] sm:$0xff]  ;;  %533 = vst.msk [vmem:[#allocation2 + $0x8] sm:$0xff] %vm531_vm1, %v1150_v22  ;;  %v651_v24 = vshrl.u32 %v650_v23, 7  ;;  %v654_v25 = vand.u32 127, %v650_v23  ;;  %1095 = vset.pattern.permute.xlu1 %v1151_v35  ;;  %1096 = vset.pattern.permute.xlu0 %v1151_v35  ;;  %vm812_vm4 = vcmask 130112  }
  0x11   : > { %s1033_s17 = sshll.u32 %s474_s16, 3  ;;  %s486_s22 = sadd.s32 %s1034_s21, %s1331_s27  ;;  %v613_v8 = vld [vmem:[%s1312_s5] sm:$0xff]  ;;  %1097 = vset.pattern.permute.xlu2 %v1151_v35  ;;  %538 = vst.msk [vmem:[#allocation4 + $0x8] sm:$0xff] %vm536_vm0, %v1152_v36 }
  0x12   : > { %s476_s20 = scalar_lea.vmem %s1307_s0, %s1033_s17  ;;  %s1241_s23 = sshll.u32 %s486_s22, 3  ;;  %v615_v10 = vld [vmem:[%s1313_s6] sm:$0xff]  ;;  %v659_v26 = vand.u32 7, %v651_v24  ;;  %v652_v27 = vadd.s32 8, %v651_v24  ;;  %534 = vst.msk [vmem:[#allocation3] sm:$0xff] %vm531_vm1, %v1152_v36 }
  0x13   : > { %v547_v1 = vld [vmem:[%s476_s20] sm:$0xff]  ;;  %s488_s26 = scalar_lea.vmem %s1308_s1, %s1241_s23  ;;  %v548_v3 = vld [vmem:[%s476_s20 + $0x8] sm:$0xff]  ;;  %535 = vst.msk [vmem:[#allocation3 + $0x8] sm:$0xff] %vm531_vm1, %v1152_v36  ;;  %s499_s20 = scalar_lea.vmem %s1309_s2, %s1241_s23 }
  0x14   : > { %1040 = vmatmul.msk.f32.vlgmr.msra.gmra.mxu0 %vm536_vm0, %v547_v1  ;;  %v589_v2 = vld [vmem:[%s488_s26] sm:$0xff]  ;;  %v581_v7 = vmul.f32 %v579_v4, %v547_v1  ;;  %v582_v15 = vmul.f32 %v579_v4, %v548_v3  ;;  %vm684_vm2 = vcmp.le.s32.totalorder %v654_v25, %v659_v26  ;;  %v666_v31 = vand.u32 7, %v652_v27  ;;  %537 = vst.msk [vmem:[#allocation4] sm:$0xff] %vm536_vm0, %v1152_v36  ;;  %s1153_s21 = smov 8   ;;  %s526_s25 = scalar_lea.vmem %s1315_s8, %s1241_s23 }
  0x15   : > { %1042 = vmatmul.msk.f32.vlgmr.msra.gmra.mxu1 %vm536_vm0, %v589_v2  ;;  %v614_v11 = vmul.f32 %v613_v8, %v589_v2  ;;  %v749_v47 = vld [vmem:[%s499_s20] sm:$0xff] }
  0x16   : > { %vm685_vm3 = vcmp.le.s32.totalorder %v654_v25, %v666_v31  ;;  %v688_v37 = vld [vmem:[#allocation2] sm:$0xff]  ;;  %771 = vmatpush.msra.mxu3 %v749_v47 }
  0x17   : > { %v689_v41 = vld [vmem:[#allocation2 + $0x8] sm:$0xff] }
  0x19   : > { %v720_v0 = vld [vmem:[#allocation3] sm:$0xff] }
  0x1a   : > { %v721_v60 = vld [vmem:[#allocation3 + $0x8] sm:$0xff] }
  0x1c   : > { %1041 = vmatmul.msk.f32.gmra.mxu0 %vm536_vm0, %v548_v3 }
  0x91   : > { %v573_v6 = vpop.f32.mrf.mxu0 }
  0x92   : > { %v583_v9 = vmul.f32 %v580_v5, %v573_v6  ;;  %v610_v13 = vpop.f32.mrf.mxu1  ;;  %v736_v6 = vld [vmem:[#allocation4 + $0x8] sm:$0xff] }
  0x93   : > { %v616_v14 = vmul.f32 %v615_v10, %v610_v13 }
  0x94   : > { %v585_v12 = vadd.f32 %v583_v9, %v581_v7  ;;  %v735_v9 = vld [vmem:[#allocation4] sm:$0xff] }
  0x95   : > { %v617_v16 = vadd.f32 %v616_v14, %v614_v11 }
  0x96   : > { %v587_v18 = vmul.f32 0.35355338, %v585_v12 }
  0x97   : > { %1043 = vmatpush.xpose.msk.msrb.mxu1 %vm536_vm0, %v617_v16  ;;  %1050 = vmatpush.xpose.msk.msra.mxu2 %vm536_vm0, %v617_v16 }
  0x99   : > { %v576_v17 = vpop.f32.mrf.mxu0 }
  0x9a   : > { %v584_v19 = vmul.f32 %v580_v5, %v576_v17  ;;  %1044 = vmatmul.msk.f32.vlgmr.msrb.gmra.mxu1 %vm536_vm0, %v587_v18 }
  0x9c   : > { %v586_v20 = vadd.f32 %v584_v19, %v582_v15 }
  0x9e   : > { %v588_v21 = vmul.f32 0.35355338, %v586_v20 }
  0xa0   : > { %1045 = vmatmul.msk.f32.vlgmr.msra.gmra.mxu2 %vm536_vm0, %v588_v21 }
 0x117   : > { %v644_v28 = vpop.f32.mrf.mxu1 }
 0x118   : > { %v686_v29 = vsel %vm684_vm2, %v644_v28, -inf }
 0x119   : > { %v690_v30 = vsel %vm536_vm0, %v686_v29, -inf }
 0x11a   : > { %691 = vmax.xlane.f32.xlu0 %v690_v30 }
 0x123   : > { %v647_v32 = vpop.f32.mrf.mxu2 }
 0x124   : > { %v687_v33 = vsel %vm685_vm3, %v647_v32, -inf }
 0x125   : > { %v693_v34 = vsel %vm536_vm0, %v687_v33, -inf }
 0x126   : > { %694 = vmax.xlane.f32.xlu0 %v693_v34 }
 0x18d   : > { %v692_v38 = vpop.xlane.xlu0 %691 }
 0x18e   : > { %v696_v39 = vmax.f32 %v688_v37, %v692_v38 }
 0x190   : > { %v698_v40 = vsub.f32 %v688_v37, %v696_v39  ;;  %783 = vst.msk [vmem:[#allocation2] sm:$0xff] %vm531_vm1, %v696_v39  ;;  %706 = vperm.xlu1 %1095, %v696_v39  }
 0x192   : > { %v700_v58 = vmul.f32 1.442695, %v698_v40 }
 0x199   : > { %v695_v42 = vpop.xlane.xlu0 %694 }
 0x19a   : > { %v697_v43 = vmax.f32 %v689_v41, %v695_v42 }
 0x19c   : > { %v699_v44 = vsub.f32 %v689_v41, %v697_v43  ;;  %784 = vst.msk [vmem:[#allocation2 + $0x8] sm:$0xff] %vm531_vm1, %v697_v43  ;;  %711 = vperm.xlu1 %1095, %v697_v43  }
 0x19e   : > { %v702_v45 = vmul.f32 1.442695, %v699_v44 }
 0x1a0   : > { %1098 = vpow2.f32 %v702_v45 }
 0x1a6   : > { %v1099_v46 = vpop.eup %1098 }
 0x1a7   : > { %744 = vperm.xlu0 %1096, %v1099_v46   ;;  %v723_v61 = vmul.f32 %v1099_v46, %v721_v60 }
 0x202   : > { %v707_v48 = vpop.permute.xlu1 %706 }
 0x203   : > { %v714_v49 = vsub.f32 %v686_v29, %v707_v48 }
 0x205   : > { %v716_v50 = vmul.f32 1.442695, %v714_v49 }
 0x207   : > { %1100 = vpow2.f32 %v716_v50 }
 0x20d   : > { %v1101_v53 = vpop.eup %1100 }
 0x20e   : > { %v712_v51 = vpop.permute.xlu1 %711  ;;  %1046 = vmatmul.msk.f32.vlgmr.msra.gmra.mxu3 %vm536_vm0, %v1101_v53  ;;  %v724_v57 = vsel %vm536_vm0, %v1101_v53, 0.0 }
 0x20f   : > { %v715_v52 = vsub.f32 %v687_v33, %v712_v51 }
 0x211   : > { %v718_v54 = vmul.f32 1.442695, %v715_v52 }
 0x213   : > { %1102 = vpow2.f32 %v718_v54 }
 0x214   : > { %1104 = vpow2.f32 %v700_v58 }
 0x219   : > { %v1103_v55 = vpop.eup %1102  ;;  %v745_v7 = vpop.permute.xlu0 %744 }
 0x21a   : > { %1047 = vmatmul.msk.f32.gmra.mxu3 %vm536_vm0, %v1103_v55  ;;  %v727_v56 = vsel %vm536_vm0, %v1103_v55, 0.0  ;;  %v1105_v59 = vpop.eup %1104  ;;  %v748_v8 = vmul.f32 %v745_v7, %v736_v6 }
 0x21b   : > { %728 = vadd.xlane.f32.xlu2 %v727_v56  ;;  %v722_v2 = vmul.f32 %v1105_v59, %v720_v0 }
 0x223   : > { %725 = vadd.xlane.f32.xlu2 %v724_v57 }
 0x23b   : > { %739 = vperm.xlu2 %1097, %v1105_v59  }
 0x28e   : > { %v729_v62 = vpop.xlane.xlu2 %728 }
 0x28f   : > { %v731_v63 = vadd.f32 %v729_v62, %v723_v61 }
 0x291   : > { %734 = vst.msk [vmem:[#allocation3 + $0x8] sm:$0xff] %vm531_vm1, %v731_v63  ;;  %v773_v1 = vpop.f32.mrf.mxu3 }
 0x296   : > { %v726_v3 = vpop.xlane.xlu2 %725 }
 0x297   : > { %v730_v4 = vadd.f32 %v726_v3, %v722_v2 }
 0x298   : > { %v789_v5 = vld [vmem:[#allocation3 + $0x8] sm:$0xff] }
 0x299   : > { %733 = vst.msk [vmem:[#allocation3] sm:$0xff] %vm531_vm1, %v730_v4  ;;  %1106 = vrcp.f32 %v789_v5 }
 0x29d   : > { %v776_v10 = vpop.f32.mrf.mxu3 }
 0x29e   : > { %v780_v11 = vadd.f32 %v776_v10, %v748_v8  ;;  %v740_v12 = vpop.permute.xlu2 %739 }
 0x29f   : > { %v1107_v13 = vpop.eup %1106  ;;  %v747_v14 = vmul.f32 %v740_v12, %v735_v9 }
 0x2a0   : > { %782 = vst.msk [vmem:[#allocation4 + $0x8] sm:$0xff] %vm536_vm0, %v780_v11  ;;  %801 = vperm.xlu1 %1095, %v1107_v13   ;;  %v788_v15 = vld [vmem:[#allocation3] sm:$0xff] }
 0x2a1   : > { %v779_v16 = vadd.f32 %v773_v1, %v747_v14  ;;  %1108 = vrcp.f32 %v788_v15 }
 0x2a3   : > { %781 = vst.msk [vmem:[#allocation4] sm:$0xff] %vm536_vm0, %v779_v16 }
 0x2a7   : > { %v1109_v17 = vpop.eup %1108  ;;  %v793_v18 = vld [vmem:[#allocation4 + $0x8] sm:$0xff] }
 0x2a8   : > { %796 = vperm.xlu1 %1095, %v1109_v17  }
 0x2aa   : > { %v792_v21 = vld [vmem:[#allocation4] sm:$0xff] }
 0x312   : > { %v802_v19 = vpop.permute.xlu1 %801 }
 0x313   : > { %v805_v20 = vmul.f32 %v802_v19, %v793_v18 }
 0x315   : > { %809 = vrot.lane.b32.xlu1 %v805_v20, %s1153_s21 }
 0x31a   : > { %v797_v22 = vpop.permute.xlu1 %796 }
 0x31b   : > { %v804_v23 = vmul.f32 %v797_v22, %v792_v21 }
 0x31d   : > { %807 = vst.msk [vmem:[%s526_s25] sm:$0xff] %vm536_vm0, %v804_v23 }
 0x387   : > { %v810_v24 = vpop.permute.xlu1 %809 }
 0x388   : > { %813 = vst.msk [vmem:[%s526_s25] sm:$0xff] %vm812_vm4, %v810_v24 }
 0x389 PF: > { %s18_s9 = sadd.s32 1, %s1148_s9   ;;  %s1316_s27 = smov %s1140_s29 }
 0x38a   : > { %p15_p8 = scmp.ge.s32.totalorder %s18_s9, 6   ;;  %s1317_s28 = smov %s1144_s30 }
 0x38b   : > { %s1318_s29 = smov %s1321_s10  ;;  %s1319_s30 = smov %s1325_s11 }
 0x38c   :  { %17 = sbr.rel (!%p15_p8) target bundleno = 3 (0x3), region = 112 }

</bundles_post_ra>
